<compile_context>
chip_gen: v7x
topology: tpu7x:2x2x1
jax: 0.10.0
libtpu: 0.0.40
codegen_flags: <defaults>
</compile_context>

<pallas_src>
import jax
import jax.numpy as jnp
from jax.experimental import pallas as pl
from jax.experimental.pallas import tpu as pltpu

INPUT_SIZE = 10
HIDDEN_SIZE = 20
LATENT_SIZE = 10

MAX_TILE_B = 2048      # f32 batch tile upper bound (multiple of 8)
MIN_TILE_B = 512       # below this, per-step overhead dominates; don't split


def encoder_kernel(x_ref, w1_ref, b1_ref, w2_ref, b2_ref, mu_ref, sg_ref):
    # hidden = relu(x @ W1 + b1)                                   [tb, H]
    h = jnp.dot(x_ref[...], w1_ref[...], preferred_element_type=jnp.float32)
    h = jnp.maximum(h + b1_ref[...], 0.0)
    # fused projection: columns are [mu | sigma]                   [tb, 2L]
    out = jnp.dot(h, w2_ref[...], preferred_element_type=jnp.float32) + b2_ref[...]
    mu_ref[...] = out[:, :LATENT_SIZE].astype(mu_ref.dtype)
    sg_ref[...] = out[:, LATENT_SIZE:].astype(sg_ref.dtype)


def _pick_batch_tile(b8):
    """b8: batch rounded up to a multiple of 8. Returns tile size (mult of 8)."""
    if b8 >= 2 * MIN_TILE_B:
        # Prefer >= 2 grid steps so the "parallel" batch axis can shard
        # across both TensorCores on v7x.
        half = pl.cdiv(pl.cdiv(b8, 2), 8) * 8
        return min(MAX_TILE_B, half)
    return min(MAX_TILE_B, max(8, b8))


def encoder_forward(x, params):
    """x: [B, INPUT_SIZE] f32.  params: fused kernel params (see pack_kernel_params)."""
    B = x.shape[0]
    w1, b1 = params["w1"], params["b1"]      # [In, H], [1, H]
    w2, b2 = params["w2"], params["b2"]      # [H, 2L], [1, 2L]

    b8 = pl.cdiv(B, 8) * 8
    tb = _pick_batch_tile(b8)
    b_pad = pl.cdiv(b8, tb) * tb
    if b_pad != B:
        x = jnp.pad(x, ((0, b_pad - B), (0, 0)))
    grid = (b_pad // tb,)

    flops = 2 * b_pad * (INPUT_SIZE * HIDDEN_SIZE + HIDDEN_SIZE * 2 * LATENT_SIZE)
    bytes_accessed = 4 * (b_pad * INPUT_SIZE + 2 * b_pad * LATENT_SIZE
                          + w1.size + b1.size + w2.size + b2.size)

    mu_full, sg_full = pl.pallas_call(
        encoder_kernel,
        out_shape=(jax.ShapeDtypeStruct((b_pad, LATENT_SIZE), jnp.float32),
                   jax.ShapeDtypeStruct((b_pad, LATENT_SIZE), jnp.float32)),
        grid=grid,
        in_specs=[
            # x: streamed batch tiles (double-buffered by the pipeline)
            pl.BlockSpec((tb, INPUT_SIZE), lambda i: (i, 0)),
            # weights / biases: full-array blocks, VMEM-resident across grid
            pl.BlockSpec(w1.shape, lambda i: (0, 0)),
            pl.BlockSpec(b1.shape, lambda i: (0, 0)),
            pl.BlockSpec(w2.shape, lambda i: (0, 0)),
            pl.BlockSpec(b2.shape, lambda i: (0, 0)),
        ],
        out_specs=(
            pl.BlockSpec((tb, LATENT_SIZE), lambda i: (i, 0)),
            pl.BlockSpec((tb, LATENT_SIZE), lambda i: (i, 0)),
        ),
        compiler_params=pltpu.CompilerParams(
            dimension_semantics=("parallel",),       # megacore-shard batch (v7x)
            vmem_limit_bytes=32 * 1024 * 1024,
        ),
        cost_estimate=pl.CostEstimate(
            flops=flops, transcendentals=0, bytes_accessed=bytes_accessed),
    )(x, w1, b1, w2, b2)

    # Padded rows (>= B) contain relu(b1)-derived junk; drop them here.
    # When B is already a multiple of tb these are identity slices (no copy).
    return mu_full[:B], sg_full[:B]


def init_raw_params(key):
    """torch.nn.Linear-style parameters (weight [out, in], bias [out])."""
    ks = jax.random.split(key, 6)
    return {
        "w_lin": jax.random.uniform(ks[0], (HIDDEN_SIZE, INPUT_SIZE),
                                    jnp.float32, -0.3, 0.3),
        "b_lin": jax.random.uniform(ks[1], (HIDDEN_SIZE,), jnp.float32, -0.3, 0.3),
        "w_mu": jax.random.uniform(ks[2], (LATENT_SIZE, HIDDEN_SIZE),
                                   jnp.float32, -0.2, 0.2),
        "b_mu": jax.random.uniform(ks[3], (LATENT_SIZE,), jnp.float32, -0.2, 0.2),
        "w_sg": jax.random.uniform(ks[4], (LATENT_SIZE, HIDDEN_SIZE),
                                   jnp.float32, -0.2, 0.2),
        "b_sg": jax.random.uniform(ks[5], (LATENT_SIZE,), jnp.float32, -0.2, 0.2),
    }


def pack_kernel_params(raw):
    """Transpose to [in, out] and fuse the mu|sigma projection (no padding)."""
    w1 = raw["w_lin"].T                                               # [In, H]
    b1 = raw["b_lin"].reshape(1, -1)                                  # [1, H]
    w2 = jnp.concatenate([raw["w_mu"].T, raw["w_sg"].T], axis=1)      # [H, 2L]
    b2 = jnp.concatenate([raw["b_mu"], raw["b_sg"]]).reshape(1, -1)   # [1, 2L]
    return {"w1": w1, "b1": b1, "w2": w2, "b2": b2}


def encoder_ref(x, raw):
    """Pure-JAX reference matching the PyTorch forward."""
    h = jnp.maximum(x @ raw["w_lin"].T + raw["b_lin"], 0.0)
    mu = h @ raw["w_mu"].T + raw["b_mu"]
    sigma = h @ raw["w_sg"].T + raw["b_sg"]
    return mu, sigma


if __name__ == "__main__":
    key = jax.random.PRNGKey(0)
    k_x, k_x2, k_p = jax.random.split(key, 3)

    raw = init_raw_params(k_p)
    params = pack_kernel_params(raw)

    # Small shape matching the module: batch=8, input_size=10.
    B = 8
    x = jax.random.normal(k_x, (B, INPUT_SIZE), jnp.float32)
    mu, sigma = encoder_forward(x, params)
    jax.block_until_ready((mu, sigma))
    mu_ref, sigma_ref = encoder_ref(x, raw)
    assert mu.shape == (B, LATENT_SIZE) and sigma.shape == (B, LATENT_SIZE)
    assert jnp.allclose(mu, mu_ref, atol=1e-5, rtol=1e-5)
    assert jnp.allclose(sigma, sigma_ref, atol=1e-5, rtol=1e-5)

    # Larger, non-multiple-of-8 batch: exercises padding + multi-tile grid.
    B2 = 1029
    x2 = jax.random.normal(k_x2, (B2, INPUT_SIZE), jnp.float32)
    mu2, sigma2 = encoder_forward(x2, params)
    jax.block_until_ready((mu2, sigma2))
    mu2_ref, sigma2_ref = encoder_ref(x2, raw)
    assert mu2.shape == (B2, LATENT_SIZE) and sigma2.shape == (B2, LATENT_SIZE)
    assert jnp.allclose(mu2, mu2_ref, atol=1e-5, rtol=1e-5)
    assert jnp.allclose(sigma2, sigma2_ref, atol=1e-5, rtol=1e-5)

    print("KERNEL_OK")
</pallas_src>

<mosaic_0001>
module attributes {stable_mosaic.version = 11 : i64} {
  func.func @encoder_kernel(%arg0: i32, %arg1: memref<8x10xf32, #tpu.memory_space<vmem>>, %arg2: memref<10x20xf32, #tpu.memory_space<vmem>>, %arg3: memref<1x20xf32, #tpu.memory_space<vmem>>, %arg4: memref<20x20xf32, #tpu.memory_space<vmem>>, %arg5: memref<1x20xf32, #tpu.memory_space<vmem>>, %arg6: memref<8x10xf32, #tpu.memory_space<vmem>>, %arg7: memref<8x10xf32, #tpu.memory_space<vmem>>) attributes {dimension_semantics = [#tpu.dimension_semantics<parallel>], iteration_bounds = array<i64: 1>, scalar_prefetch = 0 : i64, scratch_operands = 0 : i64, tpu.core_type = #tpu.core_type<tc>, window_params = [{transform_indices = @transform_0, window_bounds = array<i64: 8, 10>}, {pipeline_mode = #tpu.pipeline_mode<synchronous>, transform_indices = @transform_1, window_bounds = array<i64: 10, 20>}, {pipeline_mode = #tpu.pipeline_mode<synchronous>, transform_indices = @transform_2, window_bounds = array<i64: 1, 20>}, {pipeline_mode = #tpu.pipeline_mode<synchronous>, transform_indices = @transform_3, window_bounds = array<i64: 20, 20>}, {pipeline_mode = #tpu.pipeline_mode<synchronous>, transform_indices = @transform_4, window_bounds = array<i64: 1, 20>}, {transform_indices = @transform_5, window_bounds = array<i64: 8, 10>}, {transform_indices = @transform_6, window_bounds = array<i64: 8, 10>}]} {
    %c0 = arith.constant 0 : index
    %c0_0 = arith.constant 0 : index
    %0 = vector.load %arg1[%c0, %c0_0] : memref<8x10xf32, #tpu.memory_space<vmem>>, vector<8x10xf32>
    %c0_1 = arith.constant 0 : index
    %c0_2 = arith.constant 0 : index
    %1 = vector.load %arg2[%c0_1, %c0_2] : memref<10x20xf32, #tpu.memory_space<vmem>>, vector<10x20xf32>
    %cst = arith.constant dense<0.000000e+00> : vector<8x20xf32>
    %2 = tpu.matmul %0, %1, %cst {dimension_numbers = #tpu.dot_dimension_numbers<[1], [0], [0], [1], [0, 0, 1, 1], [], []>} : vector<8x10xf32>, vector<10x20xf32>, vector<8x20xf32> -> vector<8x20xf32>
    %c0_3 = arith.constant 0 : index
    %c0_4 = arith.constant 0 : index
    %3 = vector.load %arg3[%c0_3, %c0_4] : memref<1x20xf32, #tpu.memory_space<vmem>>, vector<1x20xf32>
    %4 = vector.broadcast %3 : vector<1x20xf32> to vector<8x20xf32>
    %5 = arith.addf %2, %4 : vector<8x20xf32>
    %cst_5 = arith.constant 0.000000e+00 : f32
    %6 = vector.broadcast %cst_5 : f32 to vector<8x20xf32>
    %7 = arith.maximumf %5, %6 : vector<8x20xf32>
    %c0_6 = arith.constant 0 : index
    %c0_7 = arith.constant 0 : index
    %8 = vector.load %arg4[%c0_6, %c0_7] : memref<20x20xf32, #tpu.memory_space<vmem>>, vector<20x20xf32>
    %cst_8 = arith.constant dense<0.000000e+00> : vector<8x20xf32>
    %9 = tpu.matmul %7, %8, %cst_8 {dimension_numbers = #tpu.dot_dimension_numbers<[1], [0], [0], [1], [0, 0, 1, 1], [], []>} : vector<8x20xf32>, vector<20x20xf32>, vector<8x20xf32> -> vector<8x20xf32>
    %c0_9 = arith.constant 0 : index
    %c0_10 = arith.constant 0 : index
    %10 = vector.load %arg5[%c0_9, %c0_10] : memref<1x20xf32, #tpu.memory_space<vmem>>, vector<1x20xf32>
    %11 = vector.broadcast %10 : vector<1x20xf32> to vector<8x20xf32>
    %12 = arith.addf %9, %11 : vector<8x20xf32>
    %13 = vector.extract_strided_slice %12 {offsets = [0, 0], sizes = [8, 10], strides = [1, 1]} : vector<8x20xf32> to vector<8x10xf32>
    %c0_11 = arith.constant 0 : index
    %c0_12 = arith.constant 0 : index
    %14 = vector.load %arg6[%c0_11, %c0_12] : memref<8x10xf32, #tpu.memory_space<vmem>>, vector<8x10xf32>
    tpu.vector_store %arg6[%c0_11, %c0_12], %13 {strides = array<i32>} : memref<8x10xf32, #tpu.memory_space<vmem>>, vector<8x10xf32>,
    %15 = vector.extract_strided_slice %12 {offsets = [0, 10], sizes = [8, 10], strides = [1, 1]} : vector<8x20xf32> to vector<8x10xf32>
    %c0_13 = arith.constant 0 : index
    %c0_14 = arith.constant 0 : index
    %16 = vector.load %arg7[%c0_13, %c0_14] : memref<8x10xf32, #tpu.memory_space<vmem>>, vector<8x10xf32>
    tpu.vector_store %arg7[%c0_13, %c0_14], %15 {strides = array<i32>} : memref<8x10xf32, #tpu.memory_space<vmem>>, vector<8x10xf32>,
    return
  }
  func.func @transform_0(%arg0: i32) -> (i32, i32) {
    %c0_i32 = arith.constant 0 : i32
    %c0_i32_0 = arith.constant 0 : i32
    return %arg0, %c0_i32 : i32, i32
  }
  func.func @transform_1(%arg0: i32) -> (i32, i32) {
    %c0_i32 = arith.constant 0 : i32
    %c0_i32_0 = arith.constant 0 : i32
    %c0_i32_1 = arith.constant 0 : i32
    return %c0_i32, %c0_i32_0 : i32, i32
  }
  func.func @transform_2(%arg0: i32) -> (i32, i32) {
    %c0_i32 = arith.constant 0 : i32
    %c0_i32_0 = arith.constant 0 : i32
    %c0_i32_1 = arith.constant 0 : i32
    return %c0_i32, %c0_i32_0 : i32, i32
  }
  func.func @transform_3(%arg0: i32) -> (i32, i32) {
    %c0_i32 = arith.constant 0 : i32
    %c0_i32_0 = arith.constant 0 : i32
    %c0_i32_1 = arith.constant 0 : i32
    return %c0_i32, %c0_i32_0 : i32, i32
  }
  func.func @transform_4(%arg0: i32) -> (i32, i32) {
    %c0_i32 = arith.constant 0 : i32
    %c0_i32_0 = arith.constant 0 : i32
    %c0_i32_1 = arith.constant 0 : i32
    return %c0_i32, %c0_i32_0 : i32, i32
  }
  func.func @transform_5(%arg0: i32) -> (i32, i32) {
    %c0_i32 = arith.constant 0 : i32
    %c0_i32_0 = arith.constant 0 : i32
    return %arg0, %c0_i32 : i32, i32
  }
  func.func @transform_6(%arg0: i32) -> (i32, i32) {
    %c0_i32 = arith.constant 0 : i32
    %c0_i32_0 = arith.constant 0 : i32
    return %arg0, %c0_i32 : i32, i32
  }
}

</mosaic_0001>

<bundles_post_ra>
// kernel: tpu_custom_call.1
= control target key start
LH: loop header
LB: loop body
LE: loop exit
PB: predicated region body
PF: predicated region fallthrough
CT: control target
= control target key end

     0   :  { %12 = vsyncpa [#allocation3], 0  ;;  %s564_s0 = inlined_call_operand.hbm [shape: f32[8,10], index: 0, kind: input, shape index: {}]   ;;  %s565_s1 = inlined_call_operand.hbm [shape: f32[10,20], index: 1, kind: input, shape index: {}]   ;;  %s566_s2 = inlined_call_operand.vmem [shape: f32[1,20], index: 2, kind: input, shape index: {}]   ;;  %s567_s3 = inlined_call_operand.hbm [shape: f32[20,20], index: 3, kind: input, shape index: {}]   ;;  %s568_s4 = inlined_call_operand.vmem [shape: f32[1,20], index: 4, kind: input, shape index: {}]   ;;  %s569_s5 = inlined_call_operand.hbm [shape: f32[8,10], index: 5, kind: output, shape index: {0}]   ;;  %s570_s6 = inlined_call_operand.hbm [shape: f32[8,10], index: 6, kind: output, shape index: {1}]  }
   0x1   :  { %13 = vsyncpa [#allocation6], 0 }
   0x2   :  { %14 = vsyncpa [#allocation4], 0 }
   0x3   :  { %15 = vsyncpa [#allocation10], 0  ;;  %s442_s21 = smov [#allocation5]   ;;  %s324_s25 = scalar_lea.hbm %s565_s1, 256 }
   0x4   :  { %s31_s22 = sshll.u32 %s442_s21, 4  ;;  %p325_p0 = scmp.ne.s32.totalorder %s565_s1, %s324_s25  ;;  %s32_s22 = int_to_ptr.vmem [resolvable:$true] %s31_s22 }
   0x5   :  { %p328_p1 = scmp.lt.u32.totalorder %s324_s25, %s565_s1 }
   0x7   :  { %p330_p2 = pnand %p328_p1, %p325_p0 }
   0x9   :  { %333 = shalt.err (!%p330_p2)
}
   0xa   :  { %s334_s30 = scalar_lea.vmem %s32_s22, 256  ;;  %p339_p4 = scmp.lt.s32.totalorder %s32_s22, %s32_s22 }
   0xb   :  { %p335_p3 = scmp.ne.s32.totalorder %s32_s22, %s334_s30  ;;  %p340_p5 = scmp.lt.s32.totalorder %s334_s30, %s334_s30 }
   0xd   :  { %p341_p6 = por %p340_p5, %p339_p4 }
   0xf   :  { %p342_p7 = pnand %p341_p6, %p335_p3 }
  0x11   :  { %345 = shalt.err (!%p342_p7)
}
  0x12   :  { %s443_s7 = smov 128   ;;  %s444_s8 = smov 8  }
  0x13   :  { %37 = dma.hbm_to_vmem [thread:$0]  %s565_s1, 256, %s32_s22, [#allocation6], %s443_s7, %s443_s7, %s444_s8  }
  0x14   :  { %s445_s11 = smov [#allocation2]   ;;  %s446_s13 = smov [#allocation7]  }
  0x15   :  { %s22_s12 = sshll.u32 %s445_s11, 4  ;;  %s45_s14 = sshll.u32 %s446_s13, 4  ;;  %s23_s12 = int_to_ptr.vmem [resolvable:$true] %s22_s12  ;;  %s46_s14 = int_to_ptr.vmem [resolvable:$true] %s45_s14 }
  0x16   :  { %s346_s17 = scalar_lea.hbm %s564_s0, 128 }
  0x17   :  { %p347_p8 = scmp.ne.s32.totalorder %s564_s0, %s346_s17  ;;  %p350_p9 = scmp.lt.u32.totalorder %s346_s17, %s564_s0 }
  0x19   :  { %p352_p10 = pnand %p350_p9, %p347_p8 }
  0x1b   :  { %355 = shalt.err (!%p352_p10)
}
  0x1c   :  { %s356_s1 = scalar_lea.vmem %s23_s12, 128  ;;  %p361_p12 = scmp.lt.s32.totalorder %s23_s12, %s23_s12 }
  0x1d   :  { %p357_p11 = scmp.ne.s32.totalorder %s23_s12, %s356_s1  ;;  %p362_p13 = scmp.lt.s32.totalorder %s356_s1, %s356_s1 }
  0x1f   :  { %p363_p0 = por %p362_p13, %p361_p12 }
  0x21   :  { %p364_p1 = pnand %p363_p0, %p357_p11 }
  0x23   :  { %367 = shalt.err (!%p364_p1)
}
  0x24   :  { %25 = dma.hbm_to_vmem [thread:$0]  %s564_s0, 128, %s23_s12, [#allocation3]  }
  0x25   :  { %s368_s26 = scalar_lea.hbm %s567_s3, 384 }
  0x26   :  { %p369_p2 = scmp.ne.s32.totalorder %s567_s3, %s368_s26  ;;  %p372_p3 = scmp.lt.u32.totalorder %s368_s26, %s567_s3 }
  0x28   :  { %p374_p4 = pnand %p372_p3, %p369_p2 }
  0x2a   :  { %377 = shalt.err (!%p374_p4)
}
  0x2b   :  { %s378_s9 = scalar_lea.vmem %s46_s14, 384  ;;  %p383_p6 = scmp.lt.s32.totalorder %s46_s14, %s46_s14 }
  0x2c   :  { %p379_p5 = scmp.ne.s32.totalorder %s46_s14, %s378_s9  ;;  %p384_p7 = scmp.lt.s32.totalorder %s378_s9, %s378_s9 }
  0x2e   :  { %p385_p8 = por %p384_p7, %p383_p6 }
  0x30   :  { %p386_p9 = pnand %p385_p8, %p379_p5 }
  0x32   :  { %389 = shalt.err (!%p386_p9)
}
  0x33   :  { %51 = dma.hbm_to_vmem [thread:$0]  %s567_s3, 384, %s46_s14, [#allocation6], %s443_s7, %s443_s7, %s444_s8  }
  0x34   :  { %434 = dma.done.wait [#allocation3], 128  }
  0x35   :  { %435 = vsyncadd [#allocation3], 4294967168 }
  0x36   :  { %436 = dma.done.wait [#allocation6], 640  }
  0x37   :  { %437 = vsyncadd [#allocation6], 4294966656  ;;  %v447_v0 = vmov 0.0|0.0   ;;  %vm448_vm0 = vmmov 0   ;;  %v449_v1 = vmov 0.0   ;;  %vm77_vm1 = vcmask 1041408  }
  0x38   :  { %305 = vmatprep.subr.bf16.mxu0 %v447_v0  ;;  %309 = vmatprep.subr.bf16.mxu1 %v447_v0  ;;  %v64_v2 = vld [vmem:[#allocation5] sm:$0xff]  ;;  %v65_v3 = vld [vmem:[#allocation5 + $0x8] sm:$0x3]  ;;  %vm450_vm2 = vmmov 1   ;;  %v63_v5 = vld [vmem:[#allocation2] sm:$0xff]  ;;  %vm73_vm4 = vcmask 80896  }
  0x39   :  { %293 = vmatprep.mubr.msk.f32.mxu0 %vm448_vm0, %v449_v1  ;;  %302 = vmatprep.mubr.msk.f32.mxu1 %vm448_vm0, %v449_v1  ;;  %vm307_vm3 = vmpackc.low %vm77_vm1, %vm450_vm2  ;;  %v306_v4 = vpack.c.bf16 %v65_v3, %v64_v2  ;;  %v152_v6 = vld [vmem:[#allocation7] sm:$0xff]  ;;  %v153_v7 = vld [vmem:[#allocation7 + $0x8] sm:$0xff]  ;;  %vm166_vm5 = vcmask 1043456   ;;  %vm162_vm6 = vcmask 162816   ;;  %s451_s12 = smov [#allocation8]   ;;  %s452_s14 = smov 118  }
  0x3a   :  { %v310_v8 = vpack.c.bf16 %v153_v7, %v152_v6  ;;  %v154_v9 = vld [vmem:[#allocation7 + $0x10] sm:$0xf]  ;;  %v276_v10 = vld [vmem:[%s566_s2] ss:$0 sm:$0xff]  ;;  %s252_s13 = sshll.u32 %s451_s12, 4  ;;  %s253_s13 = int_to_ptr.vmem [resolvable:$true] %s252_s13 }
  0x3b   :  { %308 = vmatpush3.bf16.msk.msra.mxu0 %vm307_vm3, %v306_v4  ;;  %v279_v15 = vld [vmem:[%s568_s4] ss:$0 sm:$0xff]  ;;  %s390_s2 = scalar_lea.vmem %s253_s13, 128  ;;  %p395_p11 = scmp.lt.s32.totalorder %s253_s13, %s253_s13 }
  0x3c   :  { %311 = vmatpush3.bf16.msra.mxu1 %v310_v8  ;;  %p391_p10 = scmp.ne.s32.totalorder %s253_s13, %s390_s2  ;;  %p396_p12 = scmp.lt.s32.totalorder %s390_s2, %s390_s2 }
  0x3d   :  { %300 = vmatprep.subr.mxu1 %v449_v1 }
  0x3e   :  { %294 = vmatmul.mubr.msk.f32.vlgmr.msra.gmra.mrb[0].mxu0 %vm73_vm4, %v63_v5  ;;  %p397_p13 = por %p396_p12, %p395_p11 }
  0x40   :  { %301 = vmatpush3.msk.msra.mxu1 %vm166_vm5, %v154_v9  ;;  %p398_p0 = pnand %p397_p13, %p391_p10 }
 0x111   :  { %v147_v11 = vpop.f32.mrb[0].mxu0 }
 0x112   :  { %v148_v12 = vadd.f32 %v276_v10, %v147_v11  ;;  %v295_v13 = vpop.f32.mrb[1].mxu0 }
 0x114   :  { %v151_v14 = vmax.f32 %v148_v12, 0.0 }
 0x116   :  { %303 = vmatmul.mubr.msk.f32.vlgmr.msra.gmra.mrb[0].mxu1 %vm162_vm6, %v151_v14 }
 0x1e9   :  { %v236_v16 = vpop.f32.mrb[0].mxu1 }
 0x1ea   :  { %v237_v17 = vadd.f32 %v279_v15, %v236_v16  ;;  %v304_v18 = vpop.f32.mrb[1].mxu1 }
 0x1ec   :  { %240 = vst.msk [vmem:[#allocation8] sm:$0xff] %vm73_vm4, %v237_v17  ;;  %242 = vrot.lane.b32.xlu0 %v237_v17, %s452_s14 }
 0x1ed   :  { %401 = shalt.err (!%p398_p0)
}
 0x1ee   :  { %s402_s4 = scalar_lea.hbm %s569_s5, 128 }
 0x1ef   :  { %p403_p1 = scmp.ne.s32.totalorder %s569_s5, %s402_s4  ;;  %p406_p2 = scmp.lt.u32.totalorder %s402_s4, %s569_s5 }
 0x1f1   :  { %p408_p3 = pnand %p406_p2, %p403_p1 }
 0x1f3   :  { %411 = shalt.err (!%p408_p3)
}
 0x1f4   :  { %255 = dma.vmem_to_hbm [thread:$0]  %s253_s13, 128, %s569_s5, [#allocation4]  }
 0x1f5   :  { %s453_s22 = smov [#allocation9]  }
 0x1f6   :  { %s262_s23 = sshll.u32 %s453_s22, 4  ;;  %s263_s23 = int_to_ptr.vmem [resolvable:$true] %s262_s23 }
 0x1f7   :  { %s412_s24 = scalar_lea.vmem %s263_s23, 128  ;;  %p417_p5 = scmp.lt.s32.totalorder %s263_s23, %s263_s23 }
 0x1f8   :  { %p413_p4 = scmp.ne.s32.totalorder %s263_s23, %s412_s24  ;;  %p418_p6 = scmp.lt.s32.totalorder %s412_s24, %s412_s24 }
 0x1fa   :  { %p419_p7 = por %p418_p6, %p417_p5 }
 0x1fc   :  { %p420_p8 = pnand %p419_p7, %p413_p4 }
 0x25e   :  { %v243_v19 = vpop.permute.xlu0 %242 }
 0x25f   :  { %245 = vst.msk [vmem:[#allocation9] sm:$0xff] %vm73_vm4, %v243_v19 }
 0x260   :  { %423 = shalt.err (!%p420_p8)
}
 0x261   :  { %s424_s27 = scalar_lea.hbm %s570_s6, 128 }
 0x262   :  { %p425_p9 = scmp.ne.s32.totalorder %s570_s6, %s424_s27  ;;  %p428_p10 = scmp.lt.u32.totalorder %s424_s27, %s570_s6 }
 0x264   :  { %p430_p11 = pnand %p428_p10, %p425_p9 }
 0x266   :  { %433 = shalt.err (!%p430_p11)
}
 0x267   :  { %265 = dma.vmem_to_hbm [thread:$0]  %s263_s23, 128, %s570_s6, [#allocation10]  }
 0x268   :  { %438 = dma.done.wait [#allocation4], 128  }
 0x269   :  { %439 = vsyncadd [#allocation4], 4294967168 }
 0x26a   :  { %440 = dma.done.wait [#allocation10], 128  }
 0x26b   :  { %441 = vsyncadd [#allocation10], 4294967168 }
 0x26c   :  { %272 = vsyncpa [#allocation3], 1 }
 0x26d   :  { %273 = vsyncpa [#allocation6], 1 }
 0x26e   :  { %274 = vsyncpa [#allocation4], 1 }
 0x26f   :  { %275 = vsyncpa [#allocation10], 1 }

</bundles_post_ra>
